<compile_context>
chip_gen: v5e
topology: v5e:2x2
jax: 0.10.0
libtpu: 0.0.40
codegen_flags: <defaults>
</compile_context>

<pallas_src>
import math

import jax
import jax.numpy as jnp
from jax import lax
from jax.experimental import pallas as pl
from jax.experimental.pallas import tpu as pltpu


def attention_model_kernel(
    emb_ref, mask_ref,                 # (B,S,E) bf16, (B,S) f32
    wq_ref, bq_ref,                    # (E,D) bf16, (1,D) f32   [project folded in]
    wkv_ref, bkv_ref,                  # (E,2D) bf16, (1,2D) f32 [project folded in]
    wo_ref, bo_ref, g1_ref, be1_ref,   # output dense + norm
    wi_ref, bi_ref, wii_ref, bii_ref, g2_ref, be2_ref,
    wfc_ref, bfc_ref,                  # classifier (D,1), (1,1)
    out_ref,                           # (B,1) f32
):
    x = emb_ref[...]                               # (B, S, E) bf16
    mask = mask_ref[...]                           # (B, S) f32
    B, S, E = x.shape
    D = wq_ref.shape[1]                            # = 2 * embed_dim

    def dense(h, w_ref, b_ref):
        # bf16 matmul, f32 accumulation, f32 bias.
        return (jnp.dot(h.astype(jnp.bfloat16), w_ref[...],
                        preferred_element_type=jnp.float32)
                + b_ref[...])

    def layernorm(h, g_ref, b_ref, eps=1e-12):
        # single-pass statistics: sum and sum-of-squares together.
        n = h.shape[-1]
        s1 = jnp.sum(h, axis=-1, keepdims=True)
        s2 = jnp.sum(h * h, axis=-1, keepdims=True)
        mu = s1 * (1.0 / n)
        var = jnp.maximum(s2 * (1.0 / n) - mu * mu, 0.0)
        return (h - mu) * lax.rsqrt(var + eps) * g_ref[...] + b_ref[...]

    # --- K/V for every token: one flat (B*S, E) @ (E, 2D) matmul ---
    x_flat = x.reshape(B * S, E)                   # bf16
    kv = dense(x_flat, wkv_ref, bkv_ref)           # (B*S, 2D) f32
    k = kv[:, :D].reshape(B, S, D)
    v = kv[:, D:].reshape(B, S, D)

    # --- Q only for the CLS token (position 0) ---
    q_cls = dense(x[:, 0, :], wq_ref, bq_ref)      # (B, D) f32

    # --- scaled dot-product attention, CLS query only ---
    scores = jnp.einsum("bqd,bkd->bqk",
                        q_cls[:, None, :].astype(jnp.bfloat16),
                        k.astype(jnp.bfloat16),
                        preferred_element_type=jnp.float32)      # (B, 1, S)
    scores = scores * jnp.float32(1.0 / math.sqrt(D))
    scores = jnp.where(mask[:, None, :] < 0.5, jnp.float32(-1e9), scores)
    scores = scores - jnp.max(scores, axis=-1, keepdims=True)
    probs = jnp.exp(scores)
    probs = probs * pl.reciprocal(jnp.sum(probs, axis=-1, keepdims=True),
                                  approx=True)
    ctx = jnp.einsum("bqk,bkd->bqd",
                     probs.astype(jnp.bfloat16), v.astype(jnp.bfloat16),
                     preferred_element_type=jnp.float32)         # (B, 1, D)
    h = ctx[:, 0, :]                                             # (B, D)

    # --- post-attention stack, CLS rows only (dropouts are identity) ---
    h = dense(h, wo_ref, bo_ref)                   # output dense
    h = layernorm(h, g1_ref, be1_ref)              # norm (eps=1e-12)
    h = dense(h, wi_ref, bi_ref)                   # intermediate D -> 2D
    h = dense(h, wii_ref, bii_ref)                 # inverse-intermediate 2D -> D
    h = layernorm(h, g2_ref, be2_ref)              # norm2

    logits = dense(h, wfc_ref, bfc_ref)            # (B, 1)
    out_ref[...] = jax.nn.sigmoid(logits)


def attention_model_forward(ids, attention_mask, params):
    """JAX wrapper: embedding gather + weight fusion, then one Pallas call."""
    ids = ids.astype(jnp.int32)
    mask = attention_mask.astype(jnp.float32)
    B, _S = ids.shape

    # Embedding lookup as a gather (no one-hot matmul inside the kernel).
    emb_x = jnp.take(params["emb"], ids, axis=0).astype(jnp.bfloat16)  # (B,S,E)

    # Fold `project` (wp, bp) into Q and into a fused K|V projection (f32 math,
    # then cast weights to bf16 for the MXU).
    wp, bp = params["wp"], params["bp"]
    wq_f = wp @ params["wq"]
    bq_f = bp @ params["wq"] + params["bq"]
    wkv_f = jnp.concatenate([wp @ params["wk"], wp @ params["wv"]], axis=1)
    bkv_f = jnp.concatenate([bp @ params["wk"] + params["bk"],
                             bp @ params["wv"] + params["bv"]], axis=1)

    bf16 = lambda a: a.astype(jnp.bfloat16)
    args = (
        emb_x, mask,
        bf16(wq_f), bq_f, bf16(wkv_f), bkv_f,
        bf16(params["wo"]), params["bo"], params["g1"], params["be1"],
        bf16(params["wi"]), params["bi"], bf16(params["wii"]), params["bii"],
        params["g2"], params["be2"],
        bf16(params["wfc"]), params["bfc"],
    )

    vmem_spec = pl.BlockSpec(memory_space=pltpu.MemorySpace.VMEM)
    # TODO(synk): for realistic vocab / embed_dim sizes, keep the embedding
    # table in HBM (pl.ANY) with a DMA'd lookup and add a parallel batch grid
    # axis (2 TensorCores on v7x); at this toy size everything fits in VMEM.
    return pl.pallas_call(
        attention_model_kernel,
        out_shape=jax.ShapeDtypeStruct((B, 1), jnp.float32),
        in_specs=[vmem_spec] * len(args),
        out_specs=vmem_spec,
        compiler_params=pltpu.CompilerParams(vmem_limit_bytes=64 * 1024 * 1024),
    )(*args)


def init_params(key, vocab, embed_dim):
    """Deterministic synthetic parameters (PyTorch nn.Linear-style init)."""
    D = 2 * embed_dim
    keys = jax.random.split(key, 10)

    def lin(k, fin, fout):
        kw, kb = jax.random.split(k)
        bound = 1.0 / math.sqrt(fin)
        w = jax.random.uniform(kw, (fin, fout), jnp.float32, -bound, bound)
        b = jax.random.uniform(kb, (1, fout), jnp.float32, -bound, bound)
        return w, b

    p = {}
    p["emb"] = jax.random.normal(keys[0], (vocab, embed_dim), jnp.float32)
    p["wp"], p["bp"] = lin(keys[1], embed_dim, D)
    p["wq"], p["bq"] = lin(keys[2], D, D)
    p["wk"], p["bk"] = lin(keys[3], D, D)
    p["wv"], p["bv"] = lin(keys[4], D, D)
    p["wo"], p["bo"] = lin(keys[5], D, D)
    p["g1"], p["be1"] = jnp.ones((1, D), jnp.float32), jnp.zeros((1, D), jnp.float32)
    p["wi"], p["bi"] = lin(keys[6], D, 2 * D)
    p["wii"], p["bii"] = lin(keys[7], 2 * D, D)
    p["g2"], p["be2"] = jnp.ones((1, D), jnp.float32), jnp.zeros((1, D), jnp.float32)
    p["wfc"], p["bfc"] = lin(keys[8], D, 1)
    return p


def reference_forward(ids, attention_mask, p):
    """Pure-JAX f32 reference mirroring the PyTorch forward (eval mode)."""
    mask = attention_mask.astype(jnp.float32)
    x = p["emb"][ids]                                          # embedding
    x = x @ p["wp"] + p["bp"]
    q = x @ p["wq"] + p["bq"]
    k = x @ p["wk"] + p["bk"]
    v = x @ p["wv"] + p["bv"]
    D = p["wp"].shape[1]
    scores = jnp.einsum("bqd,bkd->bqk", q, k) / math.sqrt(D)
    scores = jnp.where(mask[:, None, :] == 0.0, -1e9, scores)
    probs = jax.nn.softmax(scores, axis=-1)
    x = jnp.einsum("bqk,bkd->bqd", probs, v)
    x = x @ p["wo"] + p["bo"]

    def ln(h, g, b, eps=1e-12):
        mu = jnp.mean(h, axis=-1, keepdims=True)
        var = jnp.mean((h - mu) ** 2, axis=-1, keepdims=True)
        return (h - mu) / jnp.sqrt(var + eps) * g + b

    x = ln(x, p["g1"], p["be1"])
    x = x @ p["wi"] + p["bi"]
    x = x @ p["wii"] + p["bii"]
    x = ln(x, p["g2"], p["be2"])
    logits = x[:, 0, :] @ p["wfc"] + p["bfc"]
    return jax.nn.sigmoid(logits)


if __name__ == "__main__":
    B, S = 2, 8          # batch, sequence length
    VOCAB, E = 16, 16    # vocab size, embedding dim  (D = 2*E = 32)

    key = jax.random.PRNGKey(0)
    k_ids, k_params = jax.random.split(key)

    params = init_params(k_params, VOCAB, E)
    ids = jax.random.randint(k_ids, (B, S), 0, VOCAB, dtype=jnp.int32)
    # attention mask: first row fully valid, second row padded after position 4
    attention_mask = (jnp.arange(S)[None, :] < jnp.array([[S], [5]])).astype(jnp.int32)

    out = attention_model_forward(ids, attention_mask, params)
    out = jax.block_until_ready(out)

    ref = reference_forward(ids, attention_mask, params)
    assert out.shape == (B, 1)
    assert jnp.max(jnp.abs(out - ref)) < 2e-2, "kernel/reference mismatch"

    print("KERNEL_OK")
</pallas_src>

<mosaic_0001>
module attributes {stable_mosaic.version = 11 : i64} {
  func.func @attention_model_kernel(%arg0: memref<2x8x16xbf16, #tpu.memory_space<vmem>>, %arg1: memref<2x8xf32, #tpu.memory_space<vmem>>, %arg2: memref<16x32xbf16, #tpu.memory_space<vmem>>, %arg3: memref<1x32xf32, #tpu.memory_space<vmem>>, %arg4: memref<16x64xbf16, #tpu.memory_space<vmem>>, %arg5: memref<1x64xf32, #tpu.memory_space<vmem>>, %arg6: memref<32x32xbf16, #tpu.memory_space<vmem>>, %arg7: memref<1x32xf32, #tpu.memory_space<vmem>>, %arg8: memref<1x32xf32, #tpu.memory_space<vmem>>, %arg9: memref<1x32xf32, #tpu.memory_space<vmem>>, %arg10: memref<32x64xbf16, #tpu.memory_space<vmem>>, %arg11: memref<1x64xf32, #tpu.memory_space<vmem>>, %arg12: memref<64x32xbf16, #tpu.memory_space<vmem>>, %arg13: memref<1x32xf32, #tpu.memory_space<vmem>>, %arg14: memref<1x32xf32, #tpu.memory_space<vmem>>, %arg15: memref<1x32xf32, #tpu.memory_space<vmem>>, %arg16: memref<32x1xbf16, #tpu.memory_space<vmem>>, %arg17: memref<1x1xf32, #tpu.memory_space<vmem>>, %arg18: memref<2x1xf32, #tpu.memory_space<vmem>>) attributes {dimension_semantics = [], scalar_prefetch = 0 : i64, scratch_operands = 0 : i64, tpu.core_type = #tpu.core_type<tc>} {
    %c0 = arith.constant 0 : index
    %c0_0 = arith.constant 0 : index
    %c0_1 = arith.constant 0 : index
    %0 = vector.load %arg0[%c0, %c0_0, %c0_1] : memref<2x8x16xbf16, #tpu.memory_space<vmem>>, vector<2x8x16xbf16>
    %c0_2 = arith.constant 0 : index
    %c0_3 = arith.constant 0 : index
    %1 = vector.load %arg1[%c0_2, %c0_3] : memref<2x8xf32, #tpu.memory_space<vmem>>, vector<2x8xf32>
    %2 = vector.shape_cast %0 : vector<2x8x16xbf16> to vector<16x16xbf16>
    %c0_4 = arith.constant 0 : index
    %c0_5 = arith.constant 0 : index
    %3 = vector.load %arg4[%c0_4, %c0_5] : memref<16x64xbf16, #tpu.memory_space<vmem>>, vector<16x64xbf16>
    %cst = arith.constant dense<0.000000e+00> : vector<16x64xf32>
    %4 = tpu.matmul %2, %3, %cst {dimension_numbers = #tpu.dot_dimension_numbers<[1], [0], [0], [1], [0, 0, 1, 1], [], []>} : vector<16x16xbf16>, vector<16x64xbf16>, vector<16x64xf32> -> vector<16x64xf32>
    %c0_6 = arith.constant 0 : index
    %c0_7 = arith.constant 0 : index
    %5 = vector.load %arg5[%c0_6, %c0_7] : memref<1x64xf32, #tpu.memory_space<vmem>>, vector<1x64xf32>
    %6 = vector.broadcast %5 : vector<1x64xf32> to vector<16x64xf32>
    %7 = arith.addf %4, %6 : vector<16x64xf32>
    %8 = vector.extract_strided_slice %7 {offsets = [0, 0], sizes = [16, 32], strides = [1, 1]} : vector<16x64xf32> to vector<16x32xf32>
    %9 = vector.shape_cast %8 : vector<16x32xf32> to vector<2x8x32xf32>
    %10 = vector.extract_strided_slice %7 {offsets = [0, 32], sizes = [16, 32], strides = [1, 1]} : vector<16x64xf32> to vector<16x32xf32>
    %11 = vector.shape_cast %10 : vector<16x32xf32> to vector<2x8x32xf32>
    %12 = vector.extract_strided_slice %0 {offsets = [0, 0, 0], sizes = [2, 1, 16], strides = [1, 1, 1]} : vector<2x8x16xbf16> to vector<2x1x16xbf16>
    %13 = vector.shape_cast %12 : vector<2x1x16xbf16> to vector<2x16xbf16>
    %c0_8 = arith.constant 0 : index
    %c0_9 = arith.constant 0 : index
    %14 = vector.load %arg2[%c0_8, %c0_9] : memref<16x32xbf16, #tpu.memory_space<vmem>>, vector<16x32xbf16>
    %cst_10 = arith.constant dense<0.000000e+00> : vector<2x32xf32>
    %15 = tpu.matmul %13, %14, %cst_10 {dimension_numbers = #tpu.dot_dimension_numbers<[1], [0], [0], [1], [0, 0, 1, 1], [], []>} : vector<2x16xbf16>, vector<16x32xbf16>, vector<2x32xf32> -> vector<2x32xf32>
    %c0_11 = arith.constant 0 : index
    %c0_12 = arith.constant 0 : index
    %16 = vector.load %arg3[%c0_11, %c0_12] : memref<1x32xf32, #tpu.memory_space<vmem>>, vector<1x32xf32>
    %17 = vector.broadcast %16 : vector<1x32xf32> to vector<2x32xf32>
    %18 = arith.addf %15, %17 : vector<2x32xf32>
    %19 = vector.shape_cast %18 : vector<2x32xf32> to vector<2x1x32xf32>
    %20 = arith.truncf %19 : vector<2x1x32xf32> to vector<2x1x32xbf16>
    %21 = arith.truncf %9 : vector<2x8x32xf32> to vector<2x8x32xbf16>
    "tpu.trace_start"() <{level = 10 : i32, message = "bqd,bkd->bqk"}> : () -> ()
    %cst_13 = arith.constant dense<0.000000e+00> : vector<2x1x8xf32>
    %22 = tpu.matmul %20, %21, %cst_13 {dimension_numbers = #tpu.dot_dimension_numbers<[2], [2], [1], [1], [0, 0, 0, 1, 1, 1], [0], [0]>} : vector<2x1x32xbf16>, vector<2x8x32xbf16>, vector<2x1x8xf32> -> vector<2x1x8xf32>
    "tpu.trace_stop"() : () -> ()
    %cst_14 = arith.constant 0.176776692 : f32
    %23 = vector.broadcast %cst_14 : f32 to vector<2x1x8xf32>
    %24 = arith.mulf %22, %23 : vector<2x1x8xf32>
    %25 = vector.shape_cast %1 : vector<2x8xf32> to vector<2x1x8xf32>
    %cst_15 = arith.constant 5.000000e-01 : f32
    %26 = vector.broadcast %cst_15 : f32 to vector<2x1x8xf32>
    %27 = arith.cmpf olt, %25, %26 : vector<2x1x8xf32>
    %cst_16 = arith.constant -1.000000e+09 : f32
    %28 = vector.broadcast %cst_16 : f32 to vector<2x1x8xf32>
    %29 = arith.select %27, %28, %24 : vector<2x1x8xi1>, vector<2x1x8xf32>
    %cst_17 = arith.constant dense<0xFF800000> : vector<2x1xf32>
    %30 = vector.multi_reduction <maximumf>, %29, %cst_17 [2] : vector<2x1x8xf32> to vector<2x1xf32>
    %31 = vector.shape_cast %30 : vector<2x1xf32> to vector<2x1x1xf32>
    %32 = vector.broadcast %31 : vector<2x1x1xf32> to vector<2x1x8xf32>
    %33 = arith.subf %29, %32 : vector<2x1x8xf32>
    %34 = math.exp %33 : vector<2x1x8xf32>
    %cst_18 = arith.constant dense<0.000000e+00> : vector<2x1xf32>
    %35 = vector.multi_reduction <add>, %34, %cst_18 [2] : vector<2x1x8xf32> to vector<2x1xf32>
    %36 = vector.shape_cast %35 : vector<2x1xf32> to vector<2x1x1xf32>
    %37 = tpu.reciprocal %36 {approx = true} : vector<2x1x1xf32> -> vector<2x1x1xf32>
    %38 = vector.broadcast %37 : vector<2x1x1xf32> to vector<2x1x8xf32>
    %39 = arith.mulf %34, %38 : vector<2x1x8xf32>
    %40 = arith.truncf %39 : vector<2x1x8xf32> to vector<2x1x8xbf16>
    %41 = arith.truncf %11 : vector<2x8x32xf32> to vector<2x8x32xbf16>
    "tpu.trace_start"() <{level = 10 : i32, message = "bqk,bkd->bqd"}> : () -> ()
    %cst_19 = arith.constant dense<0.000000e+00> : vector<2x1x32xf32>
    %42 = tpu.matmul %40, %41, %cst_19 {dimension_numbers = #tpu.dot_dimension_numbers<[2], [1], [1], [2], [0, 0, 0, 1, 1, 2], [0], [0]>} : vector<2x1x8xbf16>, vector<2x8x32xbf16>, vector<2x1x32xf32> -> vector<2x1x32xf32>
    "tpu.trace_stop"() : () -> ()
    %43 = vector.shape_cast %42 : vector<2x1x32xf32> to vector<2x32xf32>
    %44 = arith.truncf %43 : vector<2x32xf32> to vector<2x32xbf16>
    %c0_20 = arith.constant 0 : index
    %c0_21 = arith.constant 0 : index
    %45 = vector.load %arg6[%c0_20, %c0_21] : memref<32x32xbf16, #tpu.memory_space<vmem>>, vector<32x32xbf16>
    %cst_22 = arith.constant dense<0.000000e+00> : vector<2x32xf32>
    %46 = tpu.matmul %44, %45, %cst_22 {dimension_numbers = #tpu.dot_dimension_numbers<[1], [0], [0], [1], [0, 0, 1, 1], [], []>} : vector<2x32xbf16>, vector<32x32xbf16>, vector<2x32xf32> -> vector<2x32xf32>
    %c0_23 = arith.constant 0 : index
    %c0_24 = arith.constant 0 : index
    %47 = vector.load %arg7[%c0_23, %c0_24] : memref<1x32xf32, #tpu.memory_space<vmem>>, vector<1x32xf32>
    %48 = vector.broadcast %47 : vector<1x32xf32> to vector<2x32xf32>
    %49 = arith.addf %46, %48 : vector<2x32xf32>
    %cst_25 = arith.constant dense<0.000000e+00> : vector<2xf32>
    %50 = vector.multi_reduction <add>, %49, %cst_25 [1] : vector<2x32xf32> to vector<2xf32>
    %51 = vector.shape_cast %50 : vector<2xf32> to vector<2x1xf32>
    %52 = arith.mulf %49, %49 : vector<2x32xf32>
    %cst_26 = arith.constant dense<0.000000e+00> : vector<2xf32>
    %53 = vector.multi_reduction <add>, %52, %cst_26 [1] : vector<2x32xf32> to vector<2xf32>
    %54 = vector.shape_cast %53 : vector<2xf32> to vector<2x1xf32>
    %cst_27 = arith.constant 3.125000e-02 : f32
    %55 = vector.broadcast %cst_27 : f32 to vector<2x1xf32>
    %56 = arith.mulf %51, %55 : vector<2x1xf32>
    %cst_28 = arith.constant 3.125000e-02 : f32
    %57 = vector.broadcast %cst_28 : f32 to vector<2x1xf32>
    %58 = arith.mulf %54, %57 : vector<2x1xf32>
    %59 = arith.mulf %56, %56 : vector<2x1xf32>
    %60 = arith.subf %58, %59 : vector<2x1xf32>
    %cst_29 = arith.constant 0.000000e+00 : f32
    %61 = vector.broadcast %cst_29 : f32 to vector<2x1xf32>
    %62 = arith.maximumf %60, %61 : vector<2x1xf32>
    %63 = vector.broadcast %56 : vector<2x1xf32> to vector<2x32xf32>
    %64 = arith.subf %49, %63 : vector<2x32xf32>
    %cst_30 = arith.constant 9.99999996E-13 : f32
    %65 = vector.broadcast %cst_30 : f32 to vector<2x1xf32>
    %66 = arith.addf %62, %65 : vector<2x1xf32>
    %67 = math.rsqrt %66 : vector<2x1xf32>
    %68 = vector.broadcast %67 : vector<2x1xf32> to vector<2x32xf32>
    %69 = arith.mulf %64, %68 : vector<2x32xf32>
    %c0_31 = arith.constant 0 : index
    %c0_32 = arith.constant 0 : index
    %70 = vector.load %arg8[%c0_31, %c0_32] : memref<1x32xf32, #tpu.memory_space<vmem>>, vector<1x32xf32>
    %71 = vector.broadcast %70 : vector<1x32xf32> to vector<2x32xf32>
    %72 = arith.mulf %69, %71 : vector<2x32xf32>
    %c0_33 = arith.constant 0 : index
    %c0_34 = arith.constant 0 : index
    %73 = vector.load %arg9[%c0_33, %c0_34] : memref<1x32xf32, #tpu.memory_space<vmem>>, vector<1x32xf32>
    %74 = vector.broadcast %73 : vector<1x32xf32> to vector<2x32xf32>
    %75 = arith.addf %72, %74 : vector<2x32xf32>
    %76 = arith.truncf %75 : vector<2x32xf32> to vector<2x32xbf16>
    %c0_35 = arith.constant 0 : index
    %c0_36 = arith.constant 0 : index
    %77 = vector.load %arg10[%c0_35, %c0_36] : memref<32x64xbf16, #tpu.memory_space<vmem>>, vector<32x64xbf16>
    %cst_37 = arith.constant dense<0.000000e+00> : vector<2x64xf32>
    %78 = tpu.matmul %76, %77, %cst_37 {dimension_numbers = #tpu.dot_dimension_numbers<[1], [0], [0], [1], [0, 0, 1, 1], [], []>} : vector<2x32xbf16>, vector<32x64xbf16>, vector<2x64xf32> -> vector<2x64xf32>
    %c0_38 = arith.constant 0 : index
    %c0_39 = arith.constant 0 : index
    %79 = vector.load %arg11[%c0_38, %c0_39] : memref<1x64xf32, #tpu.memory_space<vmem>>, vector<1x64xf32>
    %80 = vector.broadcast %79 : vector<1x64xf32> to vector<2x64xf32>
    %81 = arith.addf %78, %80 : vector<2x64xf32>
    %82 = arith.truncf %81 : vector<2x64xf32> to vector<2x64xbf16>
    %c0_40 = arith.constant 0 : index
    %c0_41 = arith.constant 0 : index
    %83 = vector.load %arg12[%c0_40, %c0_41] : memref<64x32xbf16, #tpu.memory_space<vmem>>, vector<64x32xbf16>
    %cst_42 = arith.constant dense<0.000000e+00> : vector<2x32xf32>
    %84 = tpu.matmul %82, %83, %cst_42 {dimension_numbers = #tpu.dot_dimension_numbers<[1], [0], [0], [1], [0, 0, 1, 1], [], []>} : vector<2x64xbf16>, vector<64x32xbf16>, vector<2x32xf32> -> vector<2x32xf32>
    %c0_43 = arith.constant 0 : index
    %c0_44 = arith.constant 0 : index
    %85 = vector.load %arg13[%c0_43, %c0_44] : memref<1x32xf32, #tpu.memory_space<vmem>>, vector<1x32xf32>
    %86 = vector.broadcast %85 : vector<1x32xf32> to vector<2x32xf32>
    %87 = arith.addf %84, %86 : vector<2x32xf32>
    %cst_45 = arith.constant dense<0.000000e+00> : vector<2xf32>
    %88 = vector.multi_reduction <add>, %87, %cst_45 [1] : vector<2x32xf32> to vector<2xf32>
    %89 = vector.shape_cast %88 : vector<2xf32> to vector<2x1xf32>
    %90 = arith.mulf %87, %87 : vector<2x32xf32>
    %cst_46 = arith.constant dense<0.000000e+00> : vector<2xf32>
    %91 = vector.multi_reduction <add>, %90, %cst_46 [1] : vector<2x32xf32> to vector<2xf32>
    %92 = vector.shape_cast %91 : vector<2xf32> to vector<2x1xf32>
    %cst_47 = arith.constant 3.125000e-02 : f32
    %93 = vector.broadcast %cst_47 : f32 to vector<2x1xf32>
    %94 = arith.mulf %89, %93 : vector<2x1xf32>
    %cst_48 = arith.constant 3.125000e-02 : f32
    %95 = vector.broadcast %cst_48 : f32 to vector<2x1xf32>
    %96 = arith.mulf %92, %95 : vector<2x1xf32>
    %97 = arith.mulf %94, %94 : vector<2x1xf32>
    %98 = arith.subf %96, %97 : vector<2x1xf32>
    %cst_49 = arith.constant 0.000000e+00 : f32
    %99 = vector.broadcast %cst_49 : f32 to vector<2x1xf32>
    %100 = arith.maximumf %98, %99 : vector<2x1xf32>
    %101 = vector.broadcast %94 : vector<2x1xf32> to vector<2x32xf32>
    %102 = arith.subf %87, %101 : vector<2x32xf32>
    %cst_50 = arith.constant 9.99999996E-13 : f32
    %103 = vector.broadcast %cst_50 : f32 to vector<2x1xf32>
    %104 = arith.addf %100, %103 : vector<2x1xf32>
    %105 = math.rsqrt %104 : vector<2x1xf32>
    %106 = vector.broadcast %105 : vector<2x1xf32> to vector<2x32xf32>
    %107 = arith.mulf %102, %106 : vector<2x32xf32>
    %c0_51 = arith.constant 0 : index
    %c0_52 = arith.constant 0 : index
    %108 = vector.load %arg14[%c0_51, %c0_52] : memref<1x32xf32, #tpu.memory_space<vmem>>, vector<1x32xf32>
    %109 = vector.broadcast %108 : vector<1x32xf32> to vector<2x32xf32>
    %110 = arith.mulf %107, %109 : vector<2x32xf32>
    %c0_53 = arith.constant 0 : index
    %c0_54 = arith.constant 0 : index
    %111 = vector.load %arg15[%c0_53, %c0_54] : memref<1x32xf32, #tpu.memory_space<vmem>>, vector<1x32xf32>
    %112 = vector.broadcast %111 : vector<1x32xf32> to vector<2x32xf32>
    %113 = arith.addf %110, %112 : vector<2x32xf32>
    %114 = arith.truncf %113 : vector<2x32xf32> to vector<2x32xbf16>
    %c0_55 = arith.constant 0 : index
    %c0_56 = arith.constant 0 : index
    %115 = vector.load %arg16[%c0_55, %c0_56] : memref<32x1xbf16, #tpu.memory_space<vmem>>, vector<32x1xbf16>
    %cst_57 = arith.constant dense<0.000000e+00> : vector<2x1xf32>
    %116 = tpu.matmul %114, %115, %cst_57 {dimension_numbers = #tpu.dot_dimension_numbers<[1], [0], [0], [1], [0, 0, 1, 1], [], []>} : vector<2x32xbf16>, vector<32x1xbf16>, vector<2x1xf32> -> vector<2x1xf32>
    %c0_58 = arith.constant 0 : index
    %c0_59 = arith.constant 0 : index
    %117 = vector.load %arg17[%c0_58, %c0_59] : memref<1x1xf32, #tpu.memory_space<vmem>>, vector<1x1xf32>
    %118 = vector.broadcast %117 : vector<1x1xf32> to vector<2x1xf32>
    %119 = arith.addf %116, %118 : vector<2x1xf32>
    %120 = arith.negf %119 : vector<2x1xf32>
    %121 = math.exp %120 : vector<2x1xf32>
    %cst_60 = arith.constant 1.000000e+00 : f32
    %122 = vector.broadcast %cst_60 : f32 to vector<2x1xf32>
    %123 = arith.addf %122, %121 : vector<2x1xf32>
    %124 = arith.divf %122, %123 : vector<2x1xf32>
    %c0_61 = arith.constant 0 : index
    %c0_62 = arith.constant 0 : index
    %125 = vector.load %arg18[%c0_61, %c0_62] : memref<2x1xf32, #tpu.memory_space<vmem>>, vector<2x1xf32>
    tpu.vector_store %arg18[%c0_61, %c0_62], %124 {strides = array<i32>} : memref<2x1xf32, #tpu.memory_space<vmem>>, vector<2x1xf32>,
    return
  }
}

</mosaic_0001>

<bundles_post_ra>
// kernel: tpu_custom_call.1
= control target key start
LH: loop header
LB: loop body
LE: loop exit
PB: predicated region body
PF: predicated region fallthrough
CT: control target
= control target key end

     0   :  { %s952_s0 = inlined_call_operand.vmem [shape: bf16[2,8,16], index: 0, kind: input, shape index: {}]   ;;  %s953_s1 = inlined_call_operand.vmem [shape: f32[2,8], index: 1, kind: input, shape index: {}]   ;;  %s954_s2 = inlined_call_operand.vmem [shape: bf16[16,32], index: 2, kind: input, shape index: {}]   ;;  %s955_s3 = inlined_call_operand.vmem [shape: f32[1,32], index: 3, kind: input, shape index: {}]   ;;  %s956_s4 = inlined_call_operand.vmem [shape: bf16[16,64], index: 4, kind: input, shape index: {}]   ;;  %s957_s5 = inlined_call_operand.vmem [shape: f32[1,64], index: 5, kind: input, shape index: {}]   ;;  %s958_s6 = inlined_call_operand.vmem [shape: bf16[32,32], index: 6, kind: input, shape index: {}]   ;;  %s959_s7 = inlined_call_operand.vmem [shape: f32[1,32], index: 7, kind: input, shape index: {}]   ;;  %s960_s8 = inlined_call_operand.vmem [shape: f32[1,32], index: 8, kind: input, shape index: {}]   ;;  %s961_s9 = inlined_call_operand.hbm [shape: f32[1,32], index: 9, kind: input, shape index: {}]   ;;  %s962_s10 = inlined_call_operand.vmem [shape: bf16[32,64], index: 10, kind: input, shape index: {}]   ;;  %s963_s11 = inlined_call_operand.hbm [shape: f32[1,64], index: 11, kind: input, shape index: {}]   ;;  %s964_s12 = inlined_call_operand.vmem [shape: bf16[64,32], index: 12, kind: input, shape index: {}]   ;;  %s965_s13 = inlined_call_operand.hbm [shape: f32[1,32], index: 13, kind: input, shape index: {}]   ;;  %s966_s14 = inlined_call_operand.vmem [shape: f32[1,32], index: 14, kind: input, shape index: {}]   ;;  %s967_s15 = inlined_call_operand.vmem [shape: f32[1,32], index: 15, kind: input, shape index: {}]   ;;  %s968_s16 = inlined_call_operand.vmem [shape: bf16[32,1], index: 16, kind: input, shape index: {}]   ;;  %s969_s17 = inlined_call_operand.<no memory space> [shape: f32[1,1], index: 17, kind: input, shape index: {}]   ;;  %s970_s18 = inlined_call_operand.vmem [shape: f32[2,1], index: 18, kind: output, shape index: {}]  }
   0x1   :  { %971 = sst [smem:[#allocation10_spill]] %s952_s0  ;;  %v23_v0 = vstv %s969_s17 }
   0x2   :  { %972 = sst [smem:[#allocation11_spill]] %s953_s1  ;;  %24 = vst [vmem:[#allocation2] sm:$0x1] %v23_v0 }
   0x3   :  { %973 = sst [smem:[#allocation12_spill]] %s954_s2 }
   0x4   :  { %25 = vsyncpa [#allocation4], 0 }
   0x5   :  { %26 = vsyncpa [#allocation6], 0  ;;  %s63_s0 = sshll.u32 %s963_s11, 4  ;;  %s761_s19 = smov [#allocation5]   ;;  %s64_s0 = int_to_ptr.hbm [resolvable:$true] %s63_s0 }
   0x6   :  { %s65_s1 = sshll.u32 %s761_s19, 4  ;;  %s50_s22 = sshll.u32 %s961_s9, 4  ;;  %s66_s1 = int_to_ptr.vmem [resolvable:$true] %s65_s1  ;;  %s51_s22 = int_to_ptr.hbm [resolvable:$true] %s50_s22 }
   0x7   :  { %68 = dma.hbm_to_vmem [thread:$0]  %s64_s0, 16, %s66_s1, [#allocation6]  }
   0x8   :  { %s762_s2 = smov [#allocation3]   ;;  %s76_s25 = sshll.u32 %s965_s13, 4  ;;  %s77_s25 = int_to_ptr.hbm [resolvable:$true] %s76_s25 }
   0x9   :  { %s52_s23 = sshll.u32 %s762_s2, 4  ;;  %s763_s11 = smov [#allocation7]   ;;  %s53_s23 = int_to_ptr.vmem [resolvable:$true] %s52_s23 }
   0xa   :  { %55 = dma.hbm_to_vmem [thread:$0]  %s51_s22, 16, %s53_s23, [#allocation4]  }
   0xb   :  { %s78_s26 = sshll.u32 %s763_s11, 4  ;;  %s79_s26 = int_to_ptr.vmem [resolvable:$true] %s78_s26 }
   0xc   :  { %81 = dma.hbm_to_vmem [thread:$0]  %s77_s25, 16, %s79_s26, [#allocation6]  }
   0xd   :  { %757 = dma.done.wait [#allocation4], 16  }
   0xe   :  { %758 = vsyncadd [#allocation4], 4294967280 }
   0xf   :  { %759 = dma.done.wait [#allocation6], 32  }
  0x10   :  { %760 = vsyncadd [#allocation6], 4294967264  ;;  %v639_v1 = vld [vmem:[%s956_s4] sm:$0xff]  ;;  %s974_s30 = sld [smem:[#allocation10_spill]]  ;;  %vm123_vm0 = vcmask 130048   ;;  %vm152_vm1 = vcmask 1041409  }
  0x11   :  { %s975_s19 = sld [smem:[#allocation12_spill]]  ;;  %134 = vmatpush.bf16.msra.mxu0 %v639_v1  ;;  %v659_v11 = vld [vmem:[%s957_s5] ss:$0 sm:$0xff]  ;;  %vm184_vm2 = vcmask 261120   ;;  %vm266_vm3 = vcmask 1043456   ;;  %vm232_vm5 = vcmask 57344  }
  0x12   :  { %v660_v14 = vld [vmem:[%s955_s3] ss:$0 sm:$0xff]  ;;  %s764_s3 = smov 96   ;;  %s976_s2 = sld [smem:[#allocation11_spill]]  ;;  %vm262_vm7 = vcmask 64512   ;;  %v642_v1 = vld [vmem:[%s958_s6 + $0x8] sm:$0xff] }
  0x13   :  { %vm352_vm8 = vcmask 254976   ;;  %vm462_vm12 = vcmask 523264  }
  0x16   :  { %v652_v2 = vld [vmem:[%s974_s30] sm:$0xff]  }
  0x17   :  { %v640_v3 = vld [vmem:[%s975_s19] sm:$0xff]  ;;  %v653_v4 = vunpack.c.l.b16 %v652_v2  ;;  %v654_v5 = vunpack.c.h.b16 %v652_v2  ;;  %582 = vmatmul.msk.bf16.vlgmr.msra.gmra.mxu0 %vm123_vm0, %v652_v2 }
  0x18   :  { %171 = vmatpush.bf16.msra.mxu1 %v640_v3  ;;  %v105_v36 = vld [vmem:[%s976_s2] sm:$0x3] }
  0x19   :  { %v583_v6 = vunpack.i.l.s16 %v653_v4  ;;  %v584_v7 = vunpack.i.l.s16 %v654_v5  ;;  %v226_v37 = vrot.slane %v105_v36, 1  ;;  %vm228_vm6 = vcmp.lt.f32.partialorder %v105_v36, 0.5  ;;  %v641_v2 = vld [vmem:[%s958_s6] sm:$0xff] }
  0x1b   :  { %v151_v8 = vrot.slane %v584_v7, 7  ;;  %vm229_vm4 = vcmp.lt.f32.partialorder %v226_v37, 0.5 }
  0x1d   :  { %v153_v9 = vsel %vm152_vm1, %v151_v8, %v583_v6 }
  0x1e   :  { %v154_v10 = vpack.c.b16 %v153_v9, %v153_v9 }
  0x20   :  { %589 = vmatmul.msk.bf16.vlgmr.msra.gmra.mxu1 %vm123_vm0, %v154_v10 }
  0x94   :  { %v136_v12 = vpop.f32.mrf.mxu0 }
  0x95   :  { %v137_v13 = vadd.f32 %v659_v11, %v136_v12 }
  0x97   :  { %v182_v15 = vpack.c.bf16 %v137_v13, %v137_v13 }
  0x99   :  { %v189_v17 = vsel %vm184_vm2, %v182_v15, 0  ;;  %v258_v29 = vunpack.c.l.b16 %v182_v15 }
  0x9a   :  { %198 = vmatpush.bf16.xpose.msra.mxu2 %v189_v17 }
  0x9b   :  { %v259_v30 = vpack.c.b16 %v258_v29, %v258_v29  ;;  %v648_v29 = vld [vmem:[%s964_s12 + $0x18] sm:$0xff] }
  0x9c   :  { %v138_v19 = vpop.f32.mrf.mxu0 }
  0x9d   :  { %v173_v16 = vpop.f32.mrf.mxu1  ;;  %v139_v21 = vadd.f32 %v659_v11, %v138_v19 }
  0x9e   :  { %v174_v18 = vadd.f32 %v660_v14, %v173_v16  ;;  %v661_v14 = vld [vmem:[%s959_s7] ss:$0 sm:$0xff] }
  0x9f   :  { %v183_v22 = vpack.c.bf16 %v139_v21, %v139_v21  ;;  %v644_v21 = vld [vmem:[%s962_s10 + $0x8] sm:$0xff] }
  0xa0   :  { %v180_v20 = vpack.c.bf16 %v174_v18, %v174_v18  ;;  %v178_v23 = vrot.slane %v174_v18, 1 }
  0xa1   :  { %v208_v25 = vsel %vm184_vm2, %v183_v22, 0  ;;  %v284_v26 = vunpack.c.l.b16 %v183_v22  ;;  %v643_v22 = vld [vmem:[%s962_s10] sm:$0xff] }
  0xa2   :  { %590 = vmatmul.msk.bf16.vlgmr.msra.gmra.mxu2 %vm184_vm2, %v180_v20  ;;  %217 = vmatpush.bf16.xpose.msra.mxu3 %v208_v25  ;;  %v181_v28 = vpack.c.bf16 %v178_v23, %v178_v23 }
  0xa3   :  { %v285_v27 = vpack.c.b16 %v284_v26, %v284_v26  ;;  %345 = vmatpush.bf16.msrb.mxu2 %v642_v1 }
  0xa5   :  { %v175_v24 = vpop.f32.mrf.mxu1  ;;  %286 = vrot.lane.b32.xlu2 %v285_v27, %s764_s3 }
  0xa7   :  { %346 = vmatpush.bf16.msrb.mxu2 %v641_v2 }
  0xa9   :  { %591 = vmatmul.msk.bf16.vlgmr.msra.gmra.mxu3 %vm184_vm2, %v181_v28 }
  0xaa   :  { %418 = vmatpush.bf16.msrb.mxu3 %v644_v21  ;;  %v668_v21 = vld [vmem:[#allocation2] ss:$0 sm:$0xff] }
  0xad   :  { %260 = vrot.lane.b32.xlu2 %v259_v30, %s764_s3 }
  0xae   :  { %419 = vmatpush.bf16.msrb.mxu3 %v643_v22 }
  0xff   :  { %v287_v31 = vpop.permute.xlu2 %286 }
 0x100   :  { %v292_v32 = vsel %vm266_vm3, %v287_v31, 0  ;;  %v647_v31 = vld [vmem:[%s964_s12 + $0x10] sm:$0xff] }
 0x101   :  { %301 = vmatpush.bf16.msrb.mxu1 %v292_v32 }
 0x107   :  { %v261_v33 = vpop.permute.xlu2 %260 }
 0x108   :  { %v268_v34 = vsel %vm266_vm3, %v261_v33, 0  ;;  %v646_v33 = vld [vmem:[%s964_s12 + $0x8] sm:$0xff] }
 0x109   :  { %277 = vmatpush.bf16.msrb.mxu0 %v268_v34 }
 0x10d   :  { %470 = vmatpush.bf16.msra.mxu0 %v648_v29 }
 0x111   :  { %471 = vmatpush.bf16.msra.mxu0 %v647_v31 }
 0x115   :  { %472 = vmatpush.bf16.msra.mxu0 %v646_v33 }
 0x125   :  { %v200_v35 = vpop.f32.mrf.mxu2 }
 0x126   :  { %v223_v43 = vmul.f32 0.17677669, %v200_v35 }
 0x128   :  { %v230_v45 = vsel %vm228_vm6, -1e+09, %v223_v43 }
 0x129   :  { %v233_v46 = vsel %vm232_vm5, %v230_v45, -inf }
 0x12c   :  { %v219_v39 = vpop.f32.mrf.mxu3 }
 0x12d   :  { %v202_v38 = vpop.f32.mrf.mxu2  ;;  %v224_v40 = vmul.f32 0.17677669, %v219_v39 }
 0x12f   :  { %v231_v41 = vsel %vm229_vm4, -1e+09, %v224_v40 }
 0x130   :  { %v236_v42 = vsel %vm232_vm5, %v231_v41, -inf }
 0x131   :  { %237 = vmax.xlane.f32.xlu0 %v236_v42 }
 0x134   :  { %v221_v44 = vpop.f32.mrf.mxu3 }
 0x135   :  { %v663_v44 = vld [vmem:[#allocation3] ss:$0 sm:$0xff] }
 0x139   :  { %234 = vmax.xlane.f32.xlu0 %v233_v46 }
 0x1a4   :  { %v238_v47 = vpop.xlane.xlu0 %237 }
 0x1a5   :  { %v240_v48 = vsub.f32 %v231_v41, %v238_v47  ;;  %v662_v41 = vld [vmem:[%s960_s8] ss:$0 sm:$0xff] }
 0x1a7   :  { %v243_v49 = vmul.f32 1.442695, %v240_v48  ;;  %v645_v48 = vld [vmem:[%s964_s12] sm:$0xff] }
 0x1a8   :  { %473 = vmatpush.bf16.msra.mxu0 %v645_v48 }
 0x1a9   :  { %669 = vpow2.f32 %v243_v49  ;;  %v664_v49 = vld [vmem:[#allocation5] ss:$0 sm:$0xff] }
 0x1ac   :  { %v235_v50 = vpop.xlane.xlu0 %234 }
 0x1ad   :  { %v239_v51 = vsub.f32 %v230_v45, %v235_v50 }
 0x1af   :  { %v670_v52 = vpop.eup %669  ;;  %v241_v53 = vmul.f32 1.442695, %v239_v51 }
 0x1b0   :  { %v248_v54 = vsel %vm232_vm5, %v670_v52, 0.0 }
 0x1b1   :  { %671 = vpow2.f32 %v241_v53  ;;  %249 = vadd.xlane.f32.xlu1 %v248_v54  ;;  %v665_v54 = vld [vmem:[#allocation7] ss:$0 sm:$0xff] }
 0x1b7   :  { %v672_v55 = vpop.eup %671 }
 0x1b8   :  { %v245_v56 = vsel %vm232_vm5, %v672_v55, 0.0 }
 0x1b9   :  { %246 = vadd.xlane.f32.xlu1 %v245_v56 }
 0x224   :  { %v250_v57 = vpop.xlane.xlu1 %249 }
 0x225   :  { %673 = vrcp.f32 %v250_v57 }
 0x22b   :  { %v674_v58 = vpop.eup %673 }
 0x22c   :  { %v254_v59 = vmul.f32 %v674_v58, %v670_v52  ;;  %v247_v60 = vpop.xlane.xlu1 %246 }
 0x22d   :  { %675 = vrcp.f32 %v247_v60 }
 0x22e   :  { %v256_v61 = vpack.c.bf16 %v254_v59, %v254_v59 }
 0x230   :  { %593 = vmatmul.msk.bf16.vlgmr.msrb.gmra.mxu1 %vm262_vm7, %v256_v61  ;;  %v650_v61 = vld [vmem:[%s968_s16 + $0x8] sm:$0xff] }
 0x231   :  { %544 = vmatpush.bf16.msra.mxu1 %v650_v61 }
 0x233   :  { %v676_v62 = vpop.eup %675 }
 0x234   :  { %v253_v63 = vmul.f32 %v676_v62, %v672_v55  ;;  %v649_v62 = vld [vmem:[%s968_s16] sm:$0xff] }
 0x235   :  { %545 = vmatpush.bf16.msra.mxu1 %v649_v62 }
 0x236   :  { %v255_v0 = vpack.c.bf16 %v253_v63, %v253_v63 }
 0x238   :  { %592 = vmatmul.msk.bf16.vlgmr.msrb.gmra.mxu0 %vm262_vm7, %v255_v0 }
 0x2ad   :  { %v303_v3 = vpop.f32.mrf.mxu1 }
 0x2ae   :  { %v308_v4 = vpack.c.bf16 %v303_v3, %v303_v3 }
 0x2b0   :  { %v320_v5 = vunpack.c.l.b16 %v308_v4 }
 0x2b2   :  { %v321_v9 = vrot.slane %v320_v5, 7 }
 0x2b5   :  { %v279_v6 = vpop.f32.mrf.mxu0  ;;  %v305_v7 = vpop.f32.mrf.mxu1 }
 0x2b6   :  { %v307_v8 = vpack.c.bf16 %v279_v6, %v279_v6 }
 0x2b8   :  { %v319_v10 = vunpack.c.l.b16 %v307_v8 }
 0x2ba   :  { %v322_v11 = vsel %vm152_vm1, %v321_v9, %v319_v10 }
 0x2bb   :  { %v323_v12 = vpack.c.b16 %v322_v11, %v322_v11 }
 0x2bd   :  { %v281_v13 = vpop.f32.mrf.mxu0  ;;  %602 = vmatmul.msk.bf16.vlgmr.msrb.gmra.mxu2 %vm184_vm2, %v323_v12 }
 0x340   :  { %v348_v15 = vpop.f32.mrf.mxu2 }
 0x341   :  { %v349_v16 = vadd.f32 %v661_v14, %v348_v15  ;;  %v666_v14 = vld [vmem:[%s966_s14] ss:$0 sm:$0xff] }
 0x343   :  { %v353_v17 = vsel %vm352_vm8, %v349_v16, 0.0  ;;  %v356_v18 = vmul.f32 %v349_v16, %v349_v16 }
 0x344   :  { %354 = vadd.xlane.f32.xlu0 %v353_v17  ;;  %v667_v17 = vld [vmem:[%s967_s15] ss:$0 sm:$0xff] }
 0x345   :  { %v357_v19 = vsel %vm352_vm8, %v356_v18, 0.0 }
 0x346   :  { %358 = vadd.xlane.f32.xlu1 %v357_v19 }
 0x348   :  { %v350_v20 = vpop.f32.mrf.mxu2 }
 0x3b7   :  { %v355_v23 = vpop.xlane.xlu0 %354 }
 0x3b8   :  { %v360_v24 = vmul.f32 0.03125, %v355_v23 }
 0x3b9   :  { %v359_v25 = vpop.xlane.xlu1 %358 }
 0x3ba   :  { %v362_v26 = vmul.f32 %v360_v24, %v360_v24  ;;  %v361_v27 = vmul.f32 0.03125, %v359_v25  ;;  %v365_v40 = vsub.f32 %v349_v16, %v360_v24 }
 0x3bc   :  { %v363_v28 = vsub.f32 %v361_v27, %v362_v26 }
 0x3be   :  { %v364_v30 = vmax.f32 %v363_v28, 0.0 }
 0x3c0   :  { %v366_v32 = vadd.f32 1e-12, %v364_v30 }
 0x3c2   :  { %677 = vrsqrt.f32 %v366_v32  ;;  %vm373_vm10 = vweird.f32 %v366_v32 }
 0x3c8   :  { %v678_v34 = vpop.eup %677 }
 0x3c9   :  { %v368_v35 = vmul.f32 %v678_v34, %v366_v32  ;;  %vm374_vm9 = vweird.f32 %v678_v34 }
 0x3ca   :  { %vm375_vm11 = vmor %vm373_vm10, %vm374_vm9 }
 0x3cb   :  { %v369_v36 = vmul.f32 %v678_v34, %v368_v35 }
 0x3cd   :  { %v370_v37 = vmul.f32 0.5, %v369_v36 }
 0x3cf   :  { %v371_v38 = vsub.f32 1.5, %v370_v37 }
 0x3d1   :  { %v372_v39 = vmul.f32 %v678_v34, %v371_v38 }
 0x3d3   :  { %v376_v42 = vsel %vm375_vm11, %v678_v34, %v372_v39 }
 0x3d4   :  { %v377_v43 = vmul.f32 %v376_v42, %v365_v40 }
 0x3d6   :  { %v382_v45 = vmul.f32 %v662_v41, %v377_v43 }
 0x3d8   :  { %v387_v46 = vadd.f32 %v663_v44, %v382_v45 }
 0x3da   :  { %v388_v47 = vpack.c.bf16 %v387_v46, %v387_v46 }
 0x3dc   :  { %611 = vmatmul.msk.bf16.vlgmr.msrb.gmra.mxu3 %vm184_vm2, %v388_v47 }
 0x45f   :  { %v421_v50 = vpop.f32.mrf.mxu3 }
 0x460   :  { %v422_v51 = vadd.f32 %v664_v49, %v421_v50 }
 0x462   :  { %v425_v52 = vpack.c.bf16 %v422_v51, %v422_v51 }
 0x464   :  { %628 = vmatmul.msk.bf16.vlgmr.msra.gmra.mxu0 %vm462_vm12, %v425_v52 }
 0x467   :  { %v423_v53 = vpop.f32.mrf.mxu3 }
 0x4e1   :  { %v475_v55 = vpop.f32.mrf.mxu0 }
 0x4e2   :  { %v476_v56 = vadd.f32 %v665_v54, %v475_v55 }
 0x4e4   :  { %v479_v57 = vsel %vm352_vm8, %v476_v56, 0.0  ;;  %v482_v58 = vmul.f32 %v476_v56, %v476_v56 }
 0x4e5   :  { %480 = vadd.xlane.f32.xlu2 %v479_v57 }
 0x4e6   :  { %v483_v59 = vsel %vm352_vm8, %v482_v58, 0.0 }
 0x4e7   :  { %484 = vadd.xlane.f32.xlu0 %v483_v59 }
 0x4e9   :  { %v477_v60 = vpop.f32.mrf.mxu0 }
 0x558   :  { %v481_v63 = vpop.xlane.xlu2 %480 }
 0x559   :  { %v486_v0 = vmul.f32 0.03125, %v481_v63 }
 0x55a   :  { %v485_v1 = vpop.xlane.xlu0 %484 }
 0x55b   :  { %v488_v2 = vmul.f32 %v486_v0, %v486_v0  ;;  %v487_v3 = vmul.f32 0.03125, %v485_v1  ;;  %v491_v13 = vsub.f32 %v476_v56, %v486_v0 }
 0x55d   :  { %v489_v4 = vsub.f32 %v487_v3, %v488_v2 }
 0x55f   :  { %v490_v5 = vmax.f32 %v489_v4, 0.0 }
 0x561   :  { %v492_v6 = vadd.f32 1e-12, %v490_v5 }
 0x563   :  { %679 = vrsqrt.f32 %v492_v6  ;;  %vm499_vm14 = vweird.f32 %v492_v6 }
 0x569   :  { %v680_v7 = vpop.eup %679 }
 0x56a   :  { %v494_v8 = vmul.f32 %v680_v7, %v492_v6  ;;  %vm500_vm13 = vweird.f32 %v680_v7 }
 0x56b   :  { %vm501_vm15 = vmor %vm499_vm14, %vm500_vm13 }
 0x56c   :  { %v495_v9 = vmul.f32 %v680_v7, %v494_v8 }
 0x56e   :  { %v496_v10 = vmul.f32 0.5, %v495_v9 }
 0x570   :  { %v497_v11 = vsub.f32 1.5, %v496_v10 }
 0x572   :  { %v498_v12 = vmul.f32 %v680_v7, %v497_v11 }
 0x574   :  { %v502_v15 = vsel %vm501_vm15, %v680_v7, %v498_v12 }
 0x575   :  { %v503_v16 = vmul.f32 %v502_v15, %v491_v13 }
 0x577   :  { %v508_v18 = vmul.f32 %v666_v14, %v503_v16 }
 0x579   :  { %v513_v19 = vadd.f32 %v667_v17, %v508_v18 }
 0x57b   :  { %v514_v20 = vpack.c.bf16 %v513_v19, %v513_v19 }
 0x57d   :  { %637 = vmatmul.msk.bf16.vlgmr.msra.gmra.mxu1 %vm184_vm2, %v514_v20  ;;  %vm570_vm2 = vcmask 1024  }
 0x5fa   :  { %v547_v22 = vpop.f32.mrf.mxu1 }
 0x5fb   :  { %v548_v23 = vadd.f32 %v668_v21, %v547_v22 }
 0x5fd   :  { %v638_v24 = vmul.f32 -1.442695, %v548_v23 }
 0x5ff   :  { %681 = vpow2.f32 %v638_v24 }
 0x602   :  { %v549_v25 = vpop.f32.mrf.mxu1 }
 0x605   :  { %v682_v26 = vpop.eup %681 }
 0x606   :  { %v554_v27 = vadd.f32 1.0, %v682_v26 }
 0x608   :  { %683 = vrcp.f32 %v554_v27  ;;  %v566_v31 = vand.u32 2147483648, %v554_v27  ;;  %v564_v33 = vand.u32 2147483647, %v554_v27  ;;  %vm560_vm1 = vweird.f32 %v554_v27 }
 0x60a   :  { %v567_v35 = vor.u32 1.1754944e-38, %v566_v31  ;;  %vm565_vm4 = vcmp.eq.f32.partialorder %v564_v33, 8.507059e+37 }
 0x60e   :  { %v684_v28 = vpop.eup %683 }
 0x60f   :  { %v556_v29 = vmul.f32 %v684_v28, %v554_v27  ;;  %vm561_vm0 = vweird.f32 %v684_v28 }
 0x610   :  { %vm562_vm3 = vmor %vm560_vm1, %vm561_vm0 }
 0x611   :  { %v557_v30 = vsub.f32 1.0, %v556_v29 }
 0x613   :  { %v558_v32 = vmul.f32 %v684_v28, %v557_v30 }
 0x615   :  { %v559_v34 = vadd.f32 %v684_v28, %v558_v32 }
 0x617   :  { %v563_v36 = vsel %vm562_vm3, %v684_v28, %v559_v34 }
 0x618   :  { %v568_v37 = vsel %vm565_vm4, %v567_v35, %v563_v36 }
 0x619   :  { %571 = vst.msk [vmem:[%s970_s18] sm:$0x3] %vm570_vm2, %v568_v37 }
 0x61a   :  { %576 = vsyncpa [#allocation4], 1 }
 0x61b   :  { %577 = vsyncpa [#allocation6], 1 }

</bundles_post_ra>
